<compile_context>
chip_gen: v7x
topology: tpu7x:2x2x1
jax: 0.10.0
libtpu: 0.0.40
codegen_flags: <defaults>
</compile_context>

<pallas_src>
import functools

import jax
import jax.numpy as jnp
from jax.experimental import pallas as pl
from jax.experimental.pallas import tpu as pltpu


def _round_up(x, m):
    return ((x + m - 1) // m) * m


def _cdiv(a, b):
    return (a + b - 1) // b


def _tpu_vmem_and_cores():
    """Best-effort generation-aware VMEM capacity (bytes) and TensorCore count."""
    vmem = 64 * 1024 * 1024          # conservative default (v7x per-TC)
    cores = 1                        # conservative default (v5e / v6e)
    try:
        info = pltpu.get_tpu_info()
        for name in ("vmem_capacity_bytes", "vmem_size_bytes", "vmem_bytes"):
            v = getattr(info, name, None)
            if isinstance(v, int) and v > 0:
                vmem = v
                break
        for name in ("num_tensorcores", "tensorcores_per_chip", "num_cores",
                     "cores_per_chip", "core_count"):
            c = getattr(info, name, None)
            if isinstance(c, int) and c > 0:
                cores = c
                break
    except Exception:
        pass
    return vmem, cores


def ffn_kernel(x_ref, w1_ref, b1_ref, wm_ref, bm_ref, w2_ref, b2_ref, o_ref,
               *scratch, num_mid, compute_dtype, stream_mid):
    """Fused FFN: lin1 -> relu -> (mid -> relu)* -> lin2 for one row tile."""
    if stream_mid:
        wbuf, wsem = scratch          # (2, H_p, H_p) VMEM buffer + 2 DMA sems

        def fetch(layer, slot):
            pltpu.make_async_copy(wm_ref.at[layer], wbuf.at[slot],
                                  wsem.at[slot]).start()

        fetch(0, 0)                   # first mid-weight DMA hides behind lin1

    x = x_ref[...].astype(compute_dtype)

    # lin1 + activation (MXU matmul, f32 accumulation, f32 bias)
    h = jnp.dot(x, w1_ref[...], preferred_element_type=jnp.float32) + b1_ref[...]
    h = jnp.maximum(h, 0.0)                      # activation = relu

    # hidden (mid) linear layers, statically unrolled (trip count known at trace)
    for i in range(num_mid):
        if stream_mid:
            slot = i & 1
            if i + 1 < num_mid:
                fetch(i + 1, 1 - slot)           # prefetch next layer's weights
            pltpu.make_async_copy(wm_ref.at[i], wbuf.at[slot], wsem.at[slot]).wait()
            w = wbuf[slot]
        else:
            w = wm_ref[i]
        h = jnp.dot(h.astype(compute_dtype), w,
                    preferred_element_type=jnp.float32) + bm_ref[i]
        h = jnp.maximum(h, 0.0)

    # lin2
    y = jnp.dot(h.astype(compute_dtype), w2_ref[...],
                preferred_element_type=jnp.float32) + b2_ref[...]

    # TODO(synk): training-mode dropout would need pltpu.prng_random_bits;
    # eval-mode dropout is the identity, which is what we implement here.
    o_ref[...] = y.astype(o_ref.dtype)


def prepare_ffn_params(w1, b1, wm, bm, w2, b2, *, compute_dtype=jnp.bfloat16):
    """Pad/cast the FFN weights ONCE (hoisted out of the per-call path).

    Weights are (fan_in, fan_out); biases (1, fan_out) / (num_mid, 1, fan_out).
    Only output feature dims are zero-padded to multiples of 128 (lane-dense and
    mathematically exact for linear+relu); lin1's contraction dim (in_dim) stays
    unpadded so x needs no feature padding at call time.
    """
    Din, H = w1.shape
    Dout = w2.shape[1]
    num_mid = int(wm.shape[0]) if wm is not None else 0
    H_p = _round_up(H, 128)
    Dout_p = _round_up(Dout, 128)

    w1_p = jnp.pad(w1, ((0, 0), (0, H_p - H))).astype(compute_dtype)
    b1_p = jnp.pad(b1, ((0, 0), (0, H_p - H))).astype(jnp.float32)
    if num_mid > 0:
        wm_p = jnp.pad(wm, ((0, 0), (0, H_p - H), (0, H_p - H))).astype(compute_dtype)
        bm_p = jnp.pad(bm, ((0, 0), (0, 0), (0, H_p - H))).astype(jnp.float32)
    else:
        # tiny dummies: never read by the kernel, minimal VMEM/DMA footprint
        wm_p = jnp.zeros((1, 8, 128), compute_dtype)
        bm_p = jnp.zeros((1, 1, 128), jnp.float32)
    w2_p = jnp.pad(w2, ((0, H_p - H), (0, Dout_p - Dout))).astype(compute_dtype)
    b2_p = jnp.pad(b2, ((0, 0), (0, Dout_p - Dout))).astype(jnp.float32)

    return dict(w1=w1_p, b1=b1_p, wm=wm_p, bm=bm_p, w2=w2_p, b2=b2_p,
                dims=(Din, H, Dout, H_p, Dout_p, num_mid),
                compute_dtype=compute_dtype)


def ffn_apply(x, prep, *, tm=512, out_dtype=None, force_stream_mid=False):
    """x: (B, S, in_dim). Returns (B, S, out_dim)."""
    B, S, Din_x = x.shape
    Din, H, Dout, H_p, Dout_p, num_mid = prep["dims"]
    assert Din_x == Din, "input feature dim does not match prepared weights"
    compute_dtype = prep["compute_dtype"]
    out_dtype = x.dtype if out_dtype is None else out_dtype

    rows = B * S
    bpe = jnp.dtype(compute_dtype).itemsize
    x_bpe = jnp.dtype(x.dtype).itemsize
    out_bpe = jnp.dtype(out_dtype).itemsize

    # ---- generation-aware VMEM budget (v5e/v6e ~128 MiB, v7x 64 MiB per TC) ----
    vmem_cap, n_cores = _tpu_vmem_and_cores()
    vmem_budget = max(32 << 20, min(int(vmem_cap * 0.85), vmem_cap - (16 << 20)))

    # ---- resident vs streamed mid-layer weight stack ----
    wm_bytes = num_mid * H_p * H_p * bpe
    base_w_bytes = (bpe * (Din * H_p + H_p * Dout_p)
                    + 4 * ((1 + max(num_mid, 1)) * H_p + Dout_p))
    stream_mid = num_mid > 0 and (force_stream_mid
                                  or base_w_bytes + wm_bytes > vmem_budget // 2)
    resident_bytes = base_w_bytes + (2 * H_p * H_p * bpe if stream_mid else wm_bytes)

    def vmem_estimate(t):
        io = 2 * t * Din * x_bpe + 2 * t * Dout_p * out_bpe   # double-buffered tiles
        act = t * H_p * (3 * 4 + 2 * bpe)   # f32 intermediates + compute-dtype casts
        return resident_bytes + io + act + (2 << 20)          # Mosaic scratch margin

    # ---- row-tile selection (rows are the "tokens" axis, kept lane-independent) ----
    sub = 16
    tm_eff = min(_round_up(tm, sub), _round_up(rows, sub))
    while tm_eff > sub and vmem_estimate(tm_eff) > vmem_budget:
        tm_eff = max(sub, _round_up(tm_eff // 2, sub))
    # split across TensorCores only when the chip actually has >1 (v7x); keep the
    # split tile 128-aligned so the 256-wide MXU keeps a clean vmatmul cadence.
    if n_cores >= 2 and rows >= 2 * 128 and _cdiv(rows, tm_eff) < 2:
        tm_eff = min(tm_eff, max(128, _round_up(_cdiv(rows, 2), 128)))
    grid_n = _cdiv(rows, tm_eff)
    rows_p = grid_n * tm_eff

    # x: tokens-major, UNPADDED feature dim (last block dim == full array dim is
    # legal even when Din % 128 != 0); only the row axis is padded when needed.
    x2 = x.reshape(rows, Din)
    if rows_p != rows:
        x2 = jnp.pad(x2, ((0, rows_p - rows), (0, 0)))

    # Grid-invariant weights: un-blocked, single VMEM-resident copy for the whole
    # grid (no per-step re-DMA; assumed single-buffered by Pallas for un-blocked
    # whole-array operands).
    resident = pl.BlockSpec(memory_space=pltpu.MemorySpace.VMEM)
    wm_spec = pl.BlockSpec(memory_space=pl.ANY) if stream_mid else resident
    scratch_shapes = ([pltpu.VMEM((2, H_p, H_p), compute_dtype),
                       pltpu.SemaphoreType.DMA((2,))] if stream_mid else [])

    kernel = functools.partial(ffn_kernel, num_mid=num_mid,
                               compute_dtype=compute_dtype, stream_mid=stream_mid)
    out = pl.pallas_call(
        kernel,
        out_shape=jax.ShapeDtypeStruct((rows_p, Dout_p), out_dtype),
        grid_spec=pltpu.PrefetchScalarGridSpec(
            num_scalar_prefetch=0,
            grid=(grid_n,),
            in_specs=[
                pl.BlockSpec((tm_eff, Din), lambda i: (i, 0)),  # x row-tile (pipelined)
                resident,   # W1
                resident,   # b1
                wm_spec,    # mid Ws (VMEM-resident or streamed from HBM)
                resident,   # mid bs
                resident,   # W2
                resident,   # b2
            ],
            out_specs=pl.BlockSpec((tm_eff, Dout_p), lambda i: (i, 0)),
            scratch_shapes=scratch_shapes,
        ),
        compiler_params=pltpu.CompilerParams(
            dimension_semantics=("parallel",),
            vmem_limit_bytes=int(vmem_budget),
        ),
    )(x2, prep["w1"], prep["b1"], prep["wm"], prep["bm"], prep["w2"], prep["b2"])
    return out[:rows, :Dout].reshape(B, S, Dout)


def transformer_ffn(x, w1, b1, wm, bm, w2, b2, *, compute_dtype=jnp.bfloat16, **kw):
    """Convenience one-shot API. In a real model, hoist prepare_ffn_params()."""
    prep = prepare_ffn_params(w1, b1, wm, bm, w2, b2, compute_dtype=compute_dtype)
    return ffn_apply(x, prep, **kw)


def init_params(key, in_dim, dim_hidden, out_dim, hidden_layers):
    """Deterministic nn.Linear-style init (uniform(-1/sqrt(fan_in), +))."""
    num_mid = hidden_layers - 1
    ks = jax.random.split(key, 6)

    def lin(kw, kb, fan_in, fan_out, leading=()):
        bound = 1.0 / jnp.sqrt(float(fan_in))
        w = jax.random.uniform(kw, leading + (fan_in, fan_out),
                               jnp.float32, -bound, bound)
        b = jax.random.uniform(kb, leading + (1, fan_out),
                               jnp.float32, -bound, bound)
        return w, b

    w1, b1 = lin(ks[0], ks[1], in_dim, dim_hidden)
    wm, bm = lin(ks[2], ks[3], dim_hidden, dim_hidden, leading=(max(num_mid, 1),))
    if num_mid == 0:
        wm, bm = wm[:0], bm[:0]
    w2, b2 = lin(ks[4], ks[5], dim_hidden, out_dim)
    return w1, b1, wm, bm, w2, b2


def reference_ffn(x, w1, b1, wm, bm, w2, b2):
    h = jnp.maximum(x @ w1 + b1[0], 0.0)
    for i in range(wm.shape[0]):
        h = jnp.maximum(h @ wm[i] + bm[i, 0], 0.0)
    return h @ w2 + b2[0]


if __name__ == "__main__":
    # Module config: in_dim=32, dim_hidden=64, out_dim=32, hidden_layers=2,
    # dropout=0.0, activation="relu".
    B, S = 2, 8
    in_dim, dim_hidden, out_dim = 32, 64, 32

    key = jax.random.PRNGKey(0)
    kx, kp, kp3 = jax.random.split(key, 3)
    x = jax.random.normal(kx, (B, S, in_dim), jnp.float32)

    params = init_params(kp, in_dim, dim_hidden, out_dim, hidden_layers=2)
    ref = reference_ffn(x, *params)

    # f32 path: exact parity with the PyTorch/JAX reference.
    prep_f32 = prepare_ffn_params(*params, compute_dtype=jnp.float32)
    out_f32 = jax.block_until_ready(ffn_apply(x, prep_f32))
    assert out_f32.shape == (B, S, out_dim)
    assert jnp.allclose(out_f32, ref, atol=1e-5, rtol=1e-5)

    # Default bf16 MXU path (f32 accumulation); weights prepared once, reused.
    prep_bf16 = prepare_ffn_params(*params)          # compute_dtype = bf16 default
    out_bf16 = jax.block_until_ready(ffn_apply(x, prep_bf16))
    out_bf16_again = jax.block_until_ready(ffn_apply(x, prep_bf16))   # no re-prep
    assert out_bf16.shape == (B, S, out_dim)
    assert jnp.allclose(out_bf16, ref, atol=3e-2, rtol=3e-2)
    assert jnp.allclose(out_bf16_again, ref, atol=3e-2, rtol=3e-2)

    # Streamed-mid-weights path (the v7x large-H fallback), forced here at small
    # shapes to validate the manual double-buffered DMA; f32 for exact parity.
    params3 = init_params(kp3, in_dim, dim_hidden, out_dim, hidden_layers=3)
    ref3 = reference_ffn(x, *params3)
    prep3 = prepare_ffn_params(*params3, compute_dtype=jnp.float32)
    out_stream = jax.block_until_ready(ffn_apply(x, prep3, force_stream_mid=True))
    assert out_stream.shape == (B, S, out_dim)
    assert jnp.allclose(out_stream, ref3, atol=1e-5, rtol=1e-5)

    print("KERNEL_OK")
</pallas_src>

<mosaic_0001>
module attributes {stable_mosaic.version = 11 : i64} {
  func.func @ffn_kernel(%arg0: i32, %arg1: memref<16x32xf32, #tpu.memory_space<vmem>>, %arg2: memref<32x128xf32, #tpu.memory_space<vmem>>, %arg3: memref<1x128xf32, #tpu.memory_space<vmem>>, %arg4: memref<1x128x128xf32, #tpu.memory_space<vmem>>, %arg5: memref<1x1x128xf32, #tpu.memory_space<vmem>>, %arg6: memref<128x128xf32, #tpu.memory_space<vmem>>, %arg7: memref<1x128xf32, #tpu.memory_space<vmem>>, %arg8: memref<16x128xf32, #tpu.memory_space<vmem>>) attributes {dimension_semantics = [#tpu.dimension_semantics<parallel>], iteration_bounds = array<i64: 1>, scalar_prefetch = 0 : i64, scratch_operands = 0 : i64, tpu.core_type = #tpu.core_type<tc>, window_params = [{transform_indices = @transform_0, window_bounds = array<i64: 16, 32>}, {pipeline_mode = #tpu.pipeline_mode<synchronous>, transform_indices = @transform_1, window_bounds = array<i64: 32, 128>}, {pipeline_mode = #tpu.pipeline_mode<synchronous>, transform_indices = @transform_2, window_bounds = array<i64: 1, 128>}, {pipeline_mode = #tpu.pipeline_mode<synchronous>, transform_indices = @transform_3, window_bounds = array<i64: 1, 128, 128>}, {pipeline_mode = #tpu.pipeline_mode<synchronous>, transform_indices = @transform_4, window_bounds = array<i64: 1, 1, 128>}, {pipeline_mode = #tpu.pipeline_mode<synchronous>, transform_indices = @transform_5, window_bounds = array<i64: 128, 128>}, {pipeline_mode = #tpu.pipeline_mode<synchronous>, transform_indices = @transform_6, window_bounds = array<i64: 1, 128>}, {transform_indices = @transform_7, window_bounds = array<i64: 16, 128>}]} {
    %c0 = arith.constant 0 : index
    %c0_0 = arith.constant 0 : index
    %0 = vector.load %arg1[%c0, %c0_0] : memref<16x32xf32, #tpu.memory_space<vmem>>, vector<16x32xf32>
    %c0_1 = arith.constant 0 : index
    %c0_2 = arith.constant 0 : index
    %1 = vector.load %arg2[%c0_1, %c0_2] : memref<32x128xf32, #tpu.memory_space<vmem>>, vector<32x128xf32>
    %cst = arith.constant dense<0.000000e+00> : vector<16x128xf32>
    %2 = tpu.matmul %0, %1, %cst {dimension_numbers = #tpu.dot_dimension_numbers<[1], [0], [0], [1], [0, 0, 1, 1], [], []>} : vector<16x32xf32>, vector<32x128xf32>, vector<16x128xf32> -> vector<16x128xf32>
    %c0_3 = arith.constant 0 : index
    %c0_4 = arith.constant 0 : index
    %3 = vector.load %arg3[%c0_3, %c0_4] : memref<1x128xf32, #tpu.memory_space<vmem>>, vector<1x128xf32>
    %4 = vector.broadcast %3 : vector<1x128xf32> to vector<16x128xf32>
    %5 = arith.addf %2, %4 : vector<16x128xf32>
    %cst_5 = arith.constant 0.000000e+00 : f32
    %6 = vector.broadcast %cst_5 : f32 to vector<16x128xf32>
    %7 = arith.maximumf %5, %6 : vector<16x128xf32>
    %c0_6 = arith.constant 0 : index
    %c0_7 = arith.constant 0 : index
    %c0_8 = arith.constant 0 : index
    %8 = vector.load %arg4[%c0_6, %c0_7, %c0_8] : memref<1x128x128xf32, #tpu.memory_space<vmem>>, vector<1x128x128xf32>
    %9 = vector.shape_cast %8 : vector<1x128x128xf32> to vector<128x128xf32>
    %cst_9 = arith.constant dense<0.000000e+00> : vector<16x128xf32>
    %10 = tpu.matmul %7, %9, %cst_9 {dimension_numbers = #tpu.dot_dimension_numbers<[1], [0], [0], [1], [0, 0, 1, 1], [], []>} : vector<16x128xf32>, vector<128x128xf32>, vector<16x128xf32> -> vector<16x128xf32>
    %c0_10 = arith.constant 0 : index
    %c0_11 = arith.constant 0 : index
    %c0_12 = arith.constant 0 : index
    %11 = vector.load %arg5[%c0_10, %c0_11, %c0_12] : memref<1x1x128xf32, #tpu.memory_space<vmem>>, vector<1x1x128xf32>
    %12 = vector.shape_cast %11 : vector<1x1x128xf32> to vector<1x128xf32>
    %13 = vector.broadcast %12 : vector<1x128xf32> to vector<16x128xf32>
    %14 = arith.addf %10, %13 : vector<16x128xf32>
    %cst_13 = arith.constant 0.000000e+00 : f32
    %15 = vector.broadcast %cst_13 : f32 to vector<16x128xf32>
    %16 = arith.maximumf %14, %15 : vector<16x128xf32>
    %c0_14 = arith.constant 0 : index
    %c0_15 = arith.constant 0 : index
    %17 = vector.load %arg6[%c0_14, %c0_15] : memref<128x128xf32, #tpu.memory_space<vmem>>, vector<128x128xf32>
    %cst_16 = arith.constant dense<0.000000e+00> : vector<16x128xf32>
    %18 = tpu.matmul %16, %17, %cst_16 {dimension_numbers = #tpu.dot_dimension_numbers<[1], [0], [0], [1], [0, 0, 1, 1], [], []>} : vector<16x128xf32>, vector<128x128xf32>, vector<16x128xf32> -> vector<16x128xf32>
    %c0_17 = arith.constant 0 : index
    %c0_18 = arith.constant 0 : index
    %19 = vector.load %arg7[%c0_17, %c0_18] : memref<1x128xf32, #tpu.memory_space<vmem>>, vector<1x128xf32>
    %20 = vector.broadcast %19 : vector<1x128xf32> to vector<16x128xf32>
    %21 = arith.addf %18, %20 : vector<16x128xf32>
    %c0_19 = arith.constant 0 : index
    %c0_20 = arith.constant 0 : index
    %22 = vector.load %arg8[%c0_19, %c0_20] : memref<16x128xf32, #tpu.memory_space<vmem>>, vector<16x128xf32>
    tpu.vector_store %arg8[%c0_19, %c0_20], %21 {strides = array<i32>} : memref<16x128xf32, #tpu.memory_space<vmem>>, vector<16x128xf32>,
    return
  }
  func.func @transform_0(%arg0: i32) -> (i32, i32) {
    %c0_i32 = arith.constant 0 : i32
    %c0_i32_0 = arith.constant 0 : i32
    return %arg0, %c0_i32 : i32, i32
  }
  func.func @transform_1(%arg0: i32) -> (i32, i32) {
    %c0_i32 = arith.constant 0 : i32
    %c0_i32_0 = arith.constant 0 : i32
    %c0_i32_1 = arith.constant 0 : i32
    return %c0_i32, %c0_i32_0 : i32, i32
  }
  func.func @transform_2(%arg0: i32) -> (i32, i32) {
    %c0_i32 = arith.constant 0 : i32
    %c0_i32_0 = arith.constant 0 : i32
    %c0_i32_1 = arith.constant 0 : i32
    return %c0_i32, %c0_i32_0 : i32, i32
  }
  func.func @transform_3(%arg0: i32) -> (i32, i32, i32) {
    %c0_i32 = arith.constant 0 : i32
    %c0_i32_0 = arith.constant 0 : i32
    %c0_i32_1 = arith.constant 0 : i32
    %c0_i32_2 = arith.constant 0 : i32
    return %c0_i32, %c0_i32_0, %c0_i32_1 : i32, i32, i32
  }
  func.func @transform_4(%arg0: i32) -> (i32, i32, i32) {
    %c0_i32 = arith.constant 0 : i32
    %c0_i32_0 = arith.constant 0 : i32
    %c0_i32_1 = arith.constant 0 : i32
    %c0_i32_2 = arith.constant 0 : i32
    return %c0_i32, %c0_i32_0, %c0_i32_1 : i32, i32, i32
  }
  func.func @transform_5(%arg0: i32) -> (i32, i32) {
    %c0_i32 = arith.constant 0 : i32
    %c0_i32_0 = arith.constant 0 : i32
    %c0_i32_1 = arith.constant 0 : i32
    return %c0_i32, %c0_i32_0 : i32, i32
  }
  func.func @transform_6(%arg0: i32) -> (i32, i32) {
    %c0_i32 = arith.constant 0 : i32
    %c0_i32_0 = arith.constant 0 : i32
    %c0_i32_1 = arith.constant 0 : i32
    return %c0_i32, %c0_i32_0 : i32, i32
  }
  func.func @transform_7(%arg0: i32) -> (i32, i32) {
    %c0_i32 = arith.constant 0 : i32
    %c0_i32_0 = arith.constant 0 : i32
    return %arg0, %c0_i32 : i32, i32
  }
}

</mosaic_0001>

<bundles_post_ra>
// kernel: tpu_custom_call.1
= control target key start
LH: loop header
LB: loop body
LE: loop exit
PB: predicated region body
PF: predicated region fallthrough
CT: control target
= control target key end

     0   :  { %12 = vsyncpa [#allocation3], 0  ;;  %s870_s0 = inlined_call_operand.hbm [shape: f32[16,32], index: 0, kind: input, shape index: {}]   ;;  %s871_s1 = inlined_call_operand.hbm [shape: f32[32,128], index: 1, kind: input, shape index: {}]   ;;  %s872_s2 = inlined_call_operand.vmem [shape: f32[1,128], index: 2, kind: input, shape index: {}]   ;;  %s873_s3 = inlined_call_operand.hbm [shape: f32[1,128,128], index: 3, kind: input, shape index: {}]   ;;  %s874_s4 = inlined_call_operand.vmem [shape: f32[1,1,128], index: 4, kind: input, shape index: {}]   ;;  %s875_s5 = inlined_call_operand.hbm [shape: f32[128,128], index: 5, kind: input, shape index: {}]   ;;  %s876_s6 = inlined_call_operand.vmem [shape: f32[1,128], index: 6, kind: input, shape index: {}]   ;;  %s877_s7 = inlined_call_operand.hbm [shape: f32[16,128], index: 7, kind: output, shape index: {}]  }
   0x1   :  { %13 = vsyncpa [#allocation6], 0 }
   0x2   :  { %14 = vsyncpa [#allocation9], 0 }
   0x3   :  { %15 = vsyncpa [#allocation4], 0  ;;  %s723_s24 = smov [#allocation5]   ;;  %s724_s26 = smov [#allocation2]  }
   0x4   :  { %s33_s25 = sshll.u32 %s723_s24, 4  ;;  %s21_s27 = sshll.u32 %s724_s26, 4  ;;  %s34_s25 = int_to_ptr.vmem [resolvable:$true] %s33_s25  ;;  %s770_s27 = int_to_ptr.vmem [resolvable:$true] %s21_s27 }
   0x5   :  { %s605_s30 = scalar_lea.hbm %s871_s1, 512 }
   0x6   :  { %p606_p0 = scmp.ne.s32.totalorder %s871_s1, %s605_s30  ;;  %p609_p1 = scmp.lt.u32.totalorder %s605_s30, %s871_s1 }
   0x8   :  { %p611_p2 = pnand %p609_p1, %p606_p0 }
   0xa   :  { %614 = shalt.err (!%p611_p2)
}
   0xb   :  { %s615_s12 = scalar_lea.vmem %s34_s25, 512  ;;  %p620_p4 = scmp.lt.s32.totalorder %s34_s25, %s34_s25 }
   0xc   :  { %p616_p3 = scmp.ne.s32.totalorder %s34_s25, %s615_s12  ;;  %p621_p5 = scmp.lt.s32.totalorder %s615_s12, %s615_s12 }
   0xe   :  { %p622_p6 = por %p621_p5, %p620_p4 }
  0x10   :  { %p623_p7 = pnand %p622_p6, %p616_p3 }
  0x12   :  { %626 = shalt.err (!%p623_p7)
}
  0x13   :  { %s725_s13 = smov 128   ;;  %s726_s14 = smov 8  }
  0x14   :  { %39 = dma.hbm_to_vmem [thread:$0]  %s871_s1, 512, %s34_s25, [#allocation6], %s725_s13, %s725_s13, %s726_s14  }
  0x15   :  { %s627_s19 = scalar_lea.hbm %s870_s0, 256 }
  0x16   :  { %p628_p8 = scmp.ne.s32.totalorder %s870_s0, %s627_s19  ;;  %p631_p9 = scmp.lt.u32.totalorder %s627_s19, %s870_s0 }
  0x18   :  { %p633_p10 = pnand %p631_p9, %p628_p8 }
  0x1a   :  { %636 = shalt.err (!%p633_p10)
}
  0x1b   :  { %s637_s24 = scalar_lea.vmem %s770_s27, 256  ;;  %p642_p12 = scmp.lt.s32.totalorder %s770_s27, %s770_s27 }
  0x1c   :  { %p638_p11 = scmp.ne.s32.totalorder %s770_s27, %s637_s24  ;;  %p643_p13 = scmp.lt.s32.totalorder %s637_s24, %s637_s24 }
  0x1e   :  { %p644_p0 = por %p643_p13, %p642_p12 }
  0x20   :  { %p645_p1 = pnand %p644_p0, %p638_p11 }
  0x22   :  { %648 = shalt.err (!%p645_p1)
}
  0x23   :  { %27 = dma.hbm_to_vmem [thread:$0]  %s870_s0, 256, %s770_s27, [#allocation3], %s725_s13, %s725_s13, %s726_s14  }
  0x24   :  { %s727_s26 = smov [#allocation7]   ;;  %s728_s29 = smov [#allocation8]  }
  0x25   :  { %s47_s28 = sshll.u32 %s727_s26, 4  ;;  %s61_s30 = sshll.u32 %s728_s29, 4  ;;  %s48_s28 = int_to_ptr.vmem [resolvable:$true] %s47_s28  ;;  %s807_s30 = int_to_ptr.vmem [resolvable:$true] %s61_s30 }
  0x26   :  { %s649_s10 = scalar_lea.hbm %s873_s3, 2048 }
  0x27   :  { %p650_p2 = scmp.ne.s32.totalorder %s873_s3, %s649_s10  ;;  %p653_p3 = scmp.lt.u32.totalorder %s649_s10, %s873_s3 }
  0x29   :  { %p655_p4 = pnand %p653_p3, %p650_p2 }
  0x2b   :  { %658 = shalt.err (!%p655_p4)
}
  0x2c   :  { %s659_s0 = scalar_lea.vmem %s48_s28, 2048  ;;  %p664_p6 = scmp.lt.s32.totalorder %s48_s28, %s48_s28 }
  0x2d   :  { %p660_p5 = scmp.ne.s32.totalorder %s48_s28, %s659_s0  ;;  %p665_p7 = scmp.lt.s32.totalorder %s659_s0, %s659_s0 }
  0x2f   :  { %p666_p8 = por %p665_p7, %p664_p6 }
  0x31   :  { %p667_p9 = pnand %p666_p8, %p660_p5 }
  0x33   :  { %670 = shalt.err (!%p667_p9)
}
  0x34   :  { %53 = dma.hbm_to_vmem [thread:$0]  %s873_s3, 2048, %s48_s28, [#allocation6], %s725_s13, %s725_s13, %s726_s14  }
  0x35   :  { %s671_s20 = scalar_lea.hbm %s875_s5, 2048 }
  0x36   :  { %p672_p10 = scmp.ne.s32.totalorder %s875_s5, %s671_s20  ;;  %p675_p11 = scmp.lt.u32.totalorder %s671_s20, %s875_s5 }
  0x38   :  { %p677_p12 = pnand %p675_p11, %p672_p10 }
  0x3a   :  { %680 = shalt.err (!%p677_p12)
}
  0x3b   :  { %s681_s1 = scalar_lea.vmem %s807_s30, 2048  ;;  %p686_p0 = scmp.lt.s32.totalorder %s807_s30, %s807_s30 }
  0x3c   :  { %p682_p13 = scmp.ne.s32.totalorder %s807_s30, %s681_s1  ;;  %p687_p1 = scmp.lt.s32.totalorder %s681_s1, %s681_s1 }
  0x3e   :  { %p688_p2 = por %p687_p1, %p686_p0 }
  0x40   :  { %p689_p3 = pnand %p688_p2, %p682_p13 }
  0x42   :  { %692 = shalt.err (!%p689_p3)
}
  0x43   :  { %67 = dma.hbm_to_vmem [thread:$0]  %s875_s5, 2048, %s807_s30, [#allocation9], %s725_s13, %s725_s13, %s726_s14  }
  0x44   :  { %715 = dma.done.wait [#allocation3], 256  }
  0x45   :  { %716 = vsyncadd [#allocation3], 4294967040 }
  0x46   :  { %717 = dma.done.wait [#allocation6], 2560  }
  0x47   :  { %718 = vsyncadd [#allocation6], 4294964736 }
  0x48   :  { %719 = dma.done.wait [#allocation9], 2048  }
  0x49   :  { %720 = vsyncadd [#allocation9], 4294965248  ;;  %vm95_vm0 = vcmask 261120   ;;  %v84_v0 = vld [vmem:[#allocation5] sm:$0xff]  ;;  %v85_v1 = vld [vmem:[#allocation5 + $0x8] sm:$0xff]  ;;  %s729_s8 = smov [#allocation10]  }
  0x4a   :  { %v86_v2 = vld [vmem:[#allocation5 + $0x10] sm:$0xff]  ;;  %v526_v3 = vpack.c.bf16 %v85_v1, %v84_v0  ;;  %v87_v4 = vld [vmem:[#allocation5 + $0x18] sm:$0xff]  ;;  %v179_v7 = vld [vmem:[#allocation7] sm:$0xff]  ;;  %s384_s9 = sshll.u32 %s729_s8, 4  ;;  %s385_s9 = int_to_ptr.vmem [resolvable:$true] %s384_s9 }
  0x4b   :  { %v82_v5 = vld [vmem:[#allocation2] sm:$0xff]  ;;  %v530_v6 = vpack.c.bf16 %v87_v4, %v86_v2  ;;  %v180_v8 = vld [vmem:[#allocation7 + $0x8] sm:$0xff]  ;;  %v182_v11 = vld [vmem:[#allocation7 + $0x18] sm:$0xff]  ;;  %p698_p5 = scmp.lt.s32.totalorder %s385_s9, %s385_s9 }
  0x4c   :  { %453 = vmatprep.mubr.msk.f32.mxu0 %vm95_vm0, %v82_v5  ;;  %v181_v9 = vld [vmem:[#allocation7 + $0x10] sm:$0xff]  ;;  %527 = vmatprep.subr.bf16.mxu0 %v526_v3  ;;  %v534_v10 = vpack.c.bf16 %v180_v8, %v179_v7  ;;  %v183_v13 = vld [vmem:[#allocation7 + $0x20] sm:$0xff]  ;;  %v184_v14 = vld [vmem:[#allocation7 + $0x28] sm:$0xff] }
  0x4d   :  { %529 = vmatpush3.bf16.msra.mxu0 %v526_v3  ;;  %v538_v12 = vpack.c.bf16 %v182_v11, %v181_v9  ;;  %v542_v15 = vpack.c.bf16 %v184_v14, %v183_v13  ;;  %v83_v16 = vld [vmem:[#allocation2 + $0x8] sm:$0xff]  ;;  %v185_v17 = vld [vmem:[#allocation7 + $0x30] sm:$0xff]  ;;  %v187_v20 = vld [vmem:[#allocation7 + $0x40] sm:$0xff] }
  0x4e   :  { %531 = vmatprep.subr.bf16.mxu0 %v530_v6  ;;  %535 = vmatprep.subr.bf16.mxu1 %v534_v10  ;;  %v186_v18 = vld [vmem:[#allocation7 + $0x38] sm:$0xff]  ;;  %v188_v21 = vld [vmem:[#allocation7 + $0x48] sm:$0xff]  ;;  %v189_v23 = vld [vmem:[#allocation7 + $0x50] sm:$0xff] }
  0x4f   :  { %537 = vmatpush3.bf16.msra.mxu1 %v534_v10  ;;  %v546_v19 = vpack.c.bf16 %v186_v18, %v185_v17  ;;  %v550_v22 = vpack.c.bf16 %v188_v21, %v187_v20  ;;  %v190_v24 = vld [vmem:[#allocation7 + $0x58] sm:$0xff]  ;;  %v191_v26 = vld [vmem:[#allocation7 + $0x60] sm:$0xff]  ;;  %v192_v27 = vld [vmem:[#allocation7 + $0x68] sm:$0xff] }
  0x50   :  { %539 = vmatprep.subr.bf16.mxu1 %v538_v12  ;;  %v554_v25 = vpack.c.bf16 %v190_v24, %v189_v23  ;;  %v558_v28 = vpack.c.bf16 %v192_v27, %v191_v26  ;;  %v193_v29 = vld [vmem:[#allocation7 + $0x70] sm:$0xff]  ;;  %v194_v30 = vld [vmem:[#allocation7 + $0x78] sm:$0xff]  ;;  %v279_v32 = vld [vmem:[#allocation8] sm:$0xff] }
  0x51   :  { %533 = vmatpush3.bf16.msra.mxu0 %v530_v6  ;;  %v562_v31 = vpack.c.bf16 %v194_v30, %v193_v29  ;;  %v280_v33 = vld [vmem:[#allocation8 + $0x8] sm:$0xff]  ;;  %v281_v34 = vld [vmem:[#allocation8 + $0x10] sm:$0xff]  ;;  %v282_v36 = vld [vmem:[#allocation8 + $0x18] sm:$0xff] }
  0x52   :  { %v566_v35 = vpack.c.bf16 %v280_v33, %v279_v32  ;;  %v570_v37 = vpack.c.bf16 %v282_v36, %v281_v34  ;;  %v283_v38 = vld [vmem:[#allocation8 + $0x20] sm:$0xff]  ;;  %v284_v39 = vld [vmem:[#allocation8 + $0x28] sm:$0xff]  ;;  %v285_v41 = vld [vmem:[#allocation8 + $0x30] sm:$0xff] }
  0x53   :  { %541 = vmatpush3.bf16.msra.mxu1 %v538_v12  ;;  %v574_v40 = vpack.c.bf16 %v284_v39, %v283_v38  ;;  %v286_v42 = vld [vmem:[#allocation8 + $0x38] sm:$0xff]  ;;  %v287_v44 = vld [vmem:[#allocation8 + $0x40] sm:$0xff]  ;;  %v288_v45 = vld [vmem:[#allocation8 + $0x48] sm:$0xff] }
  0x54   :  { %454 = vmatmul.mubr.msk.f32.vlgmr.msra.gmra.mrb[0].mxu0 %vm95_vm0, %v83_v16  ;;  %543 = vmatprep.subr.bf16.mxu1 %v542_v15  ;;  %v578_v43 = vpack.c.bf16 %v286_v42, %v285_v41  ;;  %v582_v46 = vpack.c.bf16 %v288_v45, %v287_v44  ;;  %v289_v47 = vld [vmem:[#allocation8 + $0x50] sm:$0xff]  ;;  %v290_v48 = vld [vmem:[#allocation8 + $0x58] sm:$0xff]  ;;  %v291_v50 = vld [vmem:[#allocation8 + $0x60] sm:$0xff] }
  0x55   :  { %567 = vmatprep.subr.bf16.mxu0 %v566_v35  ;;  %v586_v49 = vpack.c.bf16 %v290_v48, %v289_v47  ;;  %v292_v51 = vld [vmem:[#allocation8 + $0x68] sm:$0xff]  ;;  %v398_v53 = vld [vmem:[%s872_s2] ss:$0 sm:$0xff]  ;;  %v294_v61 = vld [vmem:[#allocation8 + $0x78] sm:$0xff] }
  0x56   :  { %569 = vmatpush3.bf16.msra.mxu0 %v566_v35  ;;  %v590_v52 = vpack.c.bf16 %v292_v51, %v291_v50  ;;  %v293_v60 = vld [vmem:[#allocation8 + $0x70] sm:$0xff] }
  0x57   :  { %545 = vmatpush3.bf16.msra.mxu1 %v542_v15  ;;  %571 = vmatprep.subr.bf16.mxu0 %v570_v37  ;;  %v594_v62 = vpack.c.bf16 %v294_v61, %v293_v60  ;;  %v401_v63 = vld [vmem:[%s874_s4] ss:$0 sm:$0xff]  ;;  %s693_s4 = scalar_lea.vmem %s385_s9, 256 }
  0x58   :  { %547 = vmatprep.subr.bf16.mxu1 %v546_v19  ;;  %v402_v6 = vld [vmem:[%s876_s6] ss:$0 sm:$0xff]  ;;  %p694_p4 = scmp.ne.s32.totalorder %s385_s9, %s693_s4  ;;  %p699_p6 = scmp.lt.s32.totalorder %s693_s4, %s693_s4 }
  0x5a   :  { %573 = vmatpush3.bf16.msra.mxu0 %v570_v37  ;;  %p700_p7 = por %p699_p6, %p698_p5 }
  0x5b   :  { %549 = vmatpush3.bf16.msra.mxu1 %v546_v19  ;;  %575 = vmatprep.subr.bf16.mxu0 %v574_v40 }
  0x5c   :  { %551 = vmatprep.subr.bf16.mxu1 %v550_v22  ;;  %p701_p8 = pnand %p700_p7, %p694_p4 }
  0x5e   :  { %577 = vmatpush3.bf16.msra.mxu0 %v574_v40 }
  0x5f   :  { %553 = vmatpush3.bf16.msra.mxu1 %v550_v22  ;;  %579 = vmatprep.subr.bf16.mxu0 %v578_v43 }
  0x60   :  { %555 = vmatprep.subr.bf16.mxu1 %v554_v25 }
  0x62   :  { %581 = vmatpush3.bf16.msra.mxu0 %v578_v43 }
  0x63   :  { %557 = vmatpush3.bf16.msra.mxu1 %v554_v25  ;;  %583 = vmatprep.subr.bf16.mxu0 %v582_v46 }
  0x64   :  { %559 = vmatprep.subr.bf16.mxu1 %v558_v28 }
  0x66   :  { %585 = vmatpush3.bf16.msra.mxu0 %v582_v46 }
  0x67   :  { %561 = vmatpush3.bf16.msra.mxu1 %v558_v28  ;;  %587 = vmatprep.subr.bf16.mxu0 %v586_v49 }
  0x68   :  { %563 = vmatprep.subr.bf16.mxu1 %v562_v31 }
  0x6a   :  { %589 = vmatpush3.bf16.msra.mxu0 %v586_v49 }
  0x6b   :  { %565 = vmatpush3.bf16.msra.mxu1 %v562_v31  ;;  %591 = vmatprep.subr.bf16.mxu0 %v590_v52 }
  0x6e   :  { %593 = vmatpush3.bf16.msra.mxu0 %v590_v52 }
  0x6f   :  { %595 = vmatprep.subr.bf16.mxu0 %v594_v62 }
  0x72   :  { %597 = vmatpush3.bf16.msra.mxu0 %v594_v62 }
 0x127   :  { %v455_v54 = vpop.f32.mrb[0].mxu0 }
 0x128   :  { %v174_v55 = vadd.f32 %v455_v54, %v398_v53  ;;  %v168_v56 = vpop.f32.mrb[1].mxu0 }
 0x129   :  { %v169_v57 = vadd.f32 %v398_v53, %v168_v56 }
 0x12a   :  { %v178_v59 = vmax.f32 %v174_v55, 0.0 }
 0x12b   :  { %v177_v58 = vmax.f32 %v169_v57, 0.0 }
 0x12d   :  { %488 = vmatprep.mubr.f32.mxu1 %v177_v58 }
 0x12e   :  { %489 = vmatmul.mubr.f32.vlgmr.msra.gmra.mrb[0].mxu1 %v178_v59 }
 0x201   :  { %v490_v0 = vpop.f32.mrb[0].mxu1 }
 0x202   :  { %v274_v1 = vadd.f32 %v490_v0, %v401_v63  ;;  %v268_v2 = vpop.f32.mrb[1].mxu1 }
 0x203   :  { %v269_v3 = vadd.f32 %v401_v63, %v268_v2 }
 0x204   :  { %v278_v5 = vmax.f32 %v274_v1, 0.0 }
 0x205   :  { %v277_v4 = vmax.f32 %v269_v3, 0.0 }
 0x207   :  { %523 = vmatprep.mubr.f32.mxu0 %v277_v4 }
 0x208   :  { %524 = vmatmul.mubr.f32.vlgmr.msra.gmra.mrb[2].mxu0 %v278_v5 }
 0x2db   :  { %v525_v7 = vpop.f32.mrb[2].mxu0 }
 0x2dc   :  { %v374_v8 = vadd.f32 %v525_v7, %v402_v6  ;;  %v368_v9 = vpop.f32.mrb[3].mxu0 }
 0x2dd   :  { %v369_v10 = vadd.f32 %v402_v6, %v368_v9 }
 0x2de   :  { %378 = vst [vmem:[#allocation10 + $0x8] sm:$0xff] %v374_v8 }
 0x2df   :  { %377 = vst [vmem:[#allocation10] sm:$0xff] %v369_v10 }
 0x2e0   :  { %704 = shalt.err (!%p701_p8)
}
 0x2e1   :  { %s705_s6 = scalar_lea.hbm %s877_s7, 256 }
 0x2e2   :  { %p706_p9 = scmp.ne.s32.totalorder %s877_s7, %s705_s6  ;;  %p709_p10 = scmp.lt.u32.totalorder %s705_s6, %s877_s7 }
 0x2e4   :  { %p711_p11 = pnand %p709_p10, %p706_p9 }
 0x2e6   :  { %714 = shalt.err (!%p711_p11)
}
 0x2e7   :  { %390 = dma.vmem_to_hbm [thread:$0]  %s385_s9, 256, %s877_s7, [#allocation4], %s725_s13, %s725_s13, %s726_s14  }
 0x2e8   :  { %721 = dma.done.wait [#allocation4], 256  }
 0x2e9   :  { %722 = vsyncadd [#allocation4], 4294967040 }
 0x2ea   :  { %394 = vsyncpa [#allocation3], 1 }
 0x2eb   :  { %395 = vsyncpa [#allocation6], 1 }
 0x2ec   :  { %396 = vsyncpa [#allocation9], 1 }
 0x2ed   :  { %397 = vsyncpa [#allocation4], 1 }

</bundles_post_ra>
